<compile_context>
chip_gen: v5e
topology: v5e:2x2
jax: 0.10.0
libtpu: 0.0.40
codegen_flags: <defaults>
</compile_context>

<pallas_src>
import functools

import jax
import jax.numpy as jnp
import numpy as np
from jax import lax
from jax.experimental import pallas as pl
from jax.experimental.pallas import tpu as pltpu

EPS = 1e-5
USE_BF16 = True                          # bf16 MXU operands, f32 accumulation
MXU_DTYPE = jnp.bfloat16 if USE_BF16 else jnp.float32


@functools.lru_cache(maxsize=None)
def _vmem_limit_bytes():
    """Scoped-VMEM cap: 3/4 of physical capacity (headroom for compiler scratch)."""
    try:
        cap = pltpu.get_tpu_info().vmem_capacity_bytes
    except Exception:                    # no TPU / API mismatch -> safe default
        cap = 64 * 1024 * 1024
    return int(cap * 3 // 4)


# ---------------- in-kernel helpers ----------------

def _edge_masks(H, W):
    """(HW, 1) f32 masks that zero taps falling outside the image."""
    HW = H * W
    idx = lax.broadcasted_iota(jnp.int32, (HW, 1), 0)
    col = idx % W
    row = idx // W
    ml = (col != 0).astype(jnp.float32)        # reading col w-1 invalid at w==0
    mr = (col != W - 1).astype(jnp.float32)    # reading col w+1 invalid at w==W-1
    mt = (row != 0).astype(jnp.float32)        # reading row h-1 invalid at h==0
    mb = (row != H - 1).astype(jnp.float32)    # reading row h+1 invalid at h==H-1
    return ml, mr, mt, mb


def _roll_rows(a, shift):
    # Static, non-negative sublane roll (XLU): result[i] = a[i - shift].
    return pltpu.roll(a, shift=shift % a.shape[0], axis=0)


def _conv3x3(a, w_ref, b_ref, masks, H, W):
    """3x3 / stride-1 / pad-1 conv of a flattened (H*W, Cin) f32 activation.

    Shift-and-matmul lowering with pltpu.roll taps + edge masks.  For
    9*Cin <= 128 the taps are lane-stacked along K into a single MXU matmul;
    otherwise an uninterrupted acc += dot(...) chain is used (bias added once).
    """
    HW, Cin = a.shape
    ml, mr, mt, mb = masks
    a_l = _roll_rows(a, 1) * ml            # tap (h, w-1)
    a_r = _roll_rows(a, -1) * mr           # tap (h, w+1)

    if 9 * Cin <= 128:
        row = jnp.concatenate([a_l, a, a_r], axis=1)     # dy=1 taps, (HW, 3*Cin)
        up = _roll_rows(row, W) * mt                     # dy=0 taps (row h-1)
        dn = _roll_rows(row, -W) * mb                    # dy=2 taps (row h+1)
        big = jnp.concatenate([up, row, dn], axis=1)     # (HW, 9*Cin)
        acc = jnp.dot(big.astype(MXU_DTYPE), w_ref[...],
                      preferred_element_type=jnp.float32)
    else:
        Cout = w_ref.shape[-1]
        taps = (a_l, a, a_r)
        acc = jnp.zeros((HW, Cout), jnp.float32)
        for dy, (vshift, vmask) in enumerate(((W, mt), (0, None), (-W, mb))):
            for dx in range(3):
                t = taps[dx]
                if vshift:
                    t = _roll_rows(t, vshift) * vmask
                k = dy * 3 + dx
                acc += jnp.dot(t.astype(MXU_DTYPE),
                               w_ref[k * Cin:(k + 1) * Cin, :],
                               preferred_element_type=jnp.float32)
    return acc + b_ref[...]


# ---------------- Pallas kernels ----------------

def _stats_kernel(x_ref, sum_ref, ssq_ref):
    """Column-wise (sum, sum-of-squares) accumulated across the row grid axis."""
    @pl.when(pl.program_id(0) == 0)
    def _():
        sum_ref[...] = jnp.zeros_like(sum_ref)
        ssq_ref[...] = jnp.zeros_like(ssq_ref)

    x = x_ref[...]
    sum_ref[...] += jnp.sum(x, axis=0, keepdims=True)
    ssq_ref[...] += jnp.sum(x * x, axis=0, keepdims=True)


def _bnrelu_conv1_kernel(x_ref, sc_ref, sh_ref, w_ref, b_ref,
                         z_ref, sum_ref, ssq_ref, *, H, W):
    """Fused BN1(affine)+ReLU -> conv3x3(+bias).

    Emits this image's BN2 partial statistics (sum / sumsq of z, in f32) so the
    wrapper can finish the reduction -- keeps the N grid axis 'parallel'.
    """
    masks = _edge_masks(H, W)
    x = x_ref[0]                                              # (HW, C) f32
    a = jnp.maximum(x * sc_ref[...] + sh_ref[...], 0.0)       # BN affine + ReLU
    z = _conv3x3(a, w_ref, b_ref, masks, H, W)                # (HW, F) f32
    z_ref[0] = z.astype(z_ref.dtype)                          # bf16 store
    sum_ref[0] = jnp.sum(z, axis=0, keepdims=True)            # (1, F) partials
    ssq_ref[0] = jnp.sum(z * z, axis=0, keepdims=True)


def _tail_kernel(x_ref, z_ref, sc_ref, sh_ref, w2_ref, b2_ref, w3_ref, b3_ref,
                 ws_ref, bs_ref, o_ref, *, H, W):
    """Fused BN2+ReLU -> conv3x3 -> conv1x1, plus skip conv3x3(x), plus add.

    Result is transposed to (F, HW) before the store: the lane dimension is HW
    (lane-dense vst) and the wrapper only needs a free reshape back to NCHW.
    """
    masks = _edge_masks(H, W)
    a2 = jnp.maximum(z_ref[0].astype(jnp.float32) * sc_ref[...] + sh_ref[...], 0.0)
    y = _conv3x3(a2, w2_ref, b2_ref, masks, H, W)                       # conv2 3x3
    y = jnp.dot(y.astype(MXU_DTYPE), w3_ref[...],
                preferred_element_type=jnp.float32) + b3_ref[...]       # conv3 1x1
    # TODO(synk): keep the skip conv in f32 if tighter than 5e-2 accuracy is
    # needed (raw x is cast to bf16 un-normalized inside _conv3x3).
    sk = _conv3x3(x_ref[0], ws_ref, bs_ref, masks, H, W)                # skip 3x3
    o_ref[0] = (y + sk).T.astype(o_ref.dtype)                           # (F, HW)


# ---------------- pallas_call wrappers ----------------

def _row_tile(m, cap=8192):
    t = cap
    while t >= 8:
        if t <= m and m % t == 0:
            return t
        t //= 2
    return m


def _stats_call(x2):
    rows, cols = x2.shape
    tm = _row_tile(rows)
    return pl.pallas_call(
        _stats_kernel,
        out_shape=(jax.ShapeDtypeStruct((1, cols), jnp.float32),
                   jax.ShapeDtypeStruct((1, cols), jnp.float32)),
        grid=(rows // tm,),
        in_specs=[pl.BlockSpec((tm, cols), lambda i: (i, 0))],
        out_specs=(pl.BlockSpec((1, cols), lambda i: (0, 0)),
                   pl.BlockSpec((1, cols), lambda i: (0, 0))),
        compiler_params=pltpu.CompilerParams(
            dimension_semantics=("arbitrary",),          # resident accumulator
            vmem_limit_bytes=_vmem_limit_bytes()),
    )(x2)


def bn_stats(x2, C):
    """x2: (M, C) f32  ->  per-channel (sum, sumsq), each (1, C)."""
    M = x2.shape[0]
    total = M * C
    if total % 128 == 0 and 128 % C == 0 and C < 128:
        # Lane-dense view (free reshape): channel == lane % C, so the per-lane
        # reduction folds back to per-channel sums in the wrapper.
        s, ss = _stats_call(x2.reshape(total // 128, 128))
        s = jnp.sum(s.reshape(128 // C, C), axis=0, keepdims=True)
        ss = jnp.sum(ss.reshape(128 // C, C), axis=0, keepdims=True)
        return s, ss
    return _stats_call(x2)                               # channel-minor fallback


def bnrelu_conv1(x, scale, shift, w9, b, H, W):
    N, HW, C = x.shape
    F = w9.shape[-1]
    kern = functools.partial(_bnrelu_conv1_kernel, H=H, W=W)
    return pl.pallas_call(
        kern,
        out_shape=(jax.ShapeDtypeStruct((N, HW, F), MXU_DTYPE),   # z1 (bf16)
                   jax.ShapeDtypeStruct((N, 1, F), jnp.float32),  # per-image sum
                   jax.ShapeDtypeStruct((N, 1, F), jnp.float32)), # per-image sumsq
        grid=(N,),
        in_specs=[
            pl.BlockSpec((1, HW, C), lambda n: (n, 0, 0)),   # x tile (pipelined)
            pl.BlockSpec((1, C), lambda n: (0, 0)),          # BN1 scale (resident)
            pl.BlockSpec((1, C), lambda n: (0, 0)),          # BN1 shift
            pl.BlockSpec((9 * C, F), lambda n: (0, 0)),      # conv1 weights (K-stacked)
            pl.BlockSpec((1, F), lambda n: (0, 0)),          # conv1 bias
        ],
        out_specs=(
            pl.BlockSpec((1, HW, F), lambda n: (n, 0, 0)),   # z1 tile
            pl.BlockSpec((1, 1, F), lambda n: (n, 0, 0)),    # BN2 partial sum
            pl.BlockSpec((1, 1, F), lambda n: (n, 0, 0)),    # BN2 partial sumsq
        ),
        compiler_params=pltpu.CompilerParams(
            dimension_semantics=("parallel",),   # per-image work, no accumulator
            vmem_limit_bytes=_vmem_limit_bytes()),
    )(x, scale, shift, w9, b)


def res_tail(x, z1, scale, shift, w2, b2, w3, b3, ws, bs, H, W):
    N, HW, C = x.shape
    F = w2.shape[-1]
    kern = functools.partial(_tail_kernel, H=H, W=W)
    return pl.pallas_call(
        kern,
        out_shape=jax.ShapeDtypeStruct((N, F, HW), jnp.float32),   # channel-major
        grid=(N,),
        in_specs=[
            pl.BlockSpec((1, HW, C), lambda n: (n, 0, 0)),   # x tile (skip branch)
            pl.BlockSpec((1, HW, F), lambda n: (n, 0, 0)),   # z1 tile (bf16)
            pl.BlockSpec((1, F), lambda n: (0, 0)),          # BN2 scale
            pl.BlockSpec((1, F), lambda n: (0, 0)),          # BN2 shift
            pl.BlockSpec((9 * F, F), lambda n: (0, 0)),      # conv2 weights (K-stacked)
            pl.BlockSpec((1, F), lambda n: (0, 0)),          # conv2 bias
            pl.BlockSpec((F, F), lambda n: (0, 0)),          # conv3 (1x1) weights
            pl.BlockSpec((1, F), lambda n: (0, 0)),          # conv3 bias
            pl.BlockSpec((9 * C, F), lambda n: (0, 0)),      # skip conv weights
            pl.BlockSpec((1, F), lambda n: (0, 0)),          # skip conv bias
        ],
        out_specs=pl.BlockSpec((1, F, HW), lambda n: (n, 0, 0)),   # lane-dense store
        compiler_params=pltpu.CompilerParams(
            dimension_semantics=("parallel",),    # independent per-image tiles
            vmem_limit_bytes=_vmem_limit_bytes()),
    )(x, z1, scale, shift, w2, b2, w3, b3, ws, bs)


# ---------------- JAX glue (layout / weight reshape / BN folding) ----------------

def _conv_w3x3(w_oihw):
    # (O, I, 3, 3) -> (9*I, O); flat K index = (dy*3 + dx)*I + i, matching the
    # in-kernel tap stacking order [up|row|dn] x [left|center|right].
    O, I, kh, kw = w_oihw.shape
    return jnp.transpose(w_oihw, (2, 3, 1, 0)).reshape(kh * kw * I, O).astype(MXU_DTYPE)


def _conv_w1x1(w_oihw):
    # (O, I, 1, 1) -> (I, O)
    return jnp.transpose(w_oihw[:, :, 0, 0], (1, 0)).astype(MXU_DTYPE)


def _affine_from_stats(s, ss, count, gamma, beta):
    mean = s / count
    var = jnp.maximum(ss / count - mean * mean, 0.0)    # clamp f32 cancellation
    scale = gamma * lax.rsqrt(var + EPS)
    shift = beta - mean * scale
    return scale, shift


def resblock_forward(params, x_nchw):
    N, C, H, W = x_nchw.shape
    F = params["w1"].shape[0]
    HW = H * W
    M = N * HW

    # NCHW -> per-image flattened NHWC rows (lane dim = channels).
    x = jnp.transpose(x_nchw, (0, 2, 3, 1)).reshape(N, HW, C)

    # BN1 batch statistics (lane-dense grid-accumulated reduction).
    s1, ss1 = bn_stats(x.reshape(M, C), C)
    scale1, shift1 = _affine_from_stats(s1, ss1, M, params["bn1_g"], params["bn1_b"])

    # Fused BN1+ReLU -> conv1 (3x3); per-image BN2 partial stats reduced here.
    z1, ps2, pss2 = bnrelu_conv1(x, scale1, shift1, _conv_w3x3(params["w1"]),
                                 params["b1"], H, W)
    scale2, shift2 = _affine_from_stats(jnp.sum(ps2, axis=0), jnp.sum(pss2, axis=0),
                                        M, params["bn2_g"], params["bn2_b"])

    # Fused BN2+ReLU -> conv2 (3x3) -> conv3 (1x1) + skip conv (3x3) + add.
    out = res_tail(x, z1, scale2, shift2,
                   _conv_w3x3(params["w2"]), params["b2"],
                   _conv_w1x1(params["w3"]), params["b3"],
                   _conv_w3x3(params["ws"]), params["bs"], H, W)

    return out.reshape(N, F, H, W)     # kernel emitted channel-major: free reshape


# ---------------- deterministic parameter init ----------------

def xavier_normal(key, shape_oihw):
    O, I, kh, kw = shape_oihw
    fan_in, fan_out = I * kh * kw, O * kh * kw
    std = (2.0 / (fan_in + fan_out)) ** 0.5
    return std * jax.random.normal(key, shape_oihw, dtype=jnp.float32)


def conv_bias(key, shape_oihw):
    O, I, kh, kw = shape_oihw
    bound = 1.0 / (I * kh * kw) ** 0.5
    return jax.random.uniform(key, (1, O), minval=-bound, maxval=bound, dtype=jnp.float32)


def init_params(key, channels, filters):
    ks = jax.random.split(key, 8)
    p = {
        "bn1_g": jnp.ones((1, channels), jnp.float32),
        "bn1_b": jnp.zeros((1, channels), jnp.float32),
        "bn2_g": jnp.ones((1, filters), jnp.float32),
        "bn2_b": jnp.zeros((1, filters), jnp.float32),
    }
    p["w1"] = xavier_normal(ks[0], (filters, channels, 3, 3))
    p["b1"] = conv_bias(ks[1], (filters, channels, 3, 3))
    p["w2"] = xavier_normal(ks[2], (filters, filters, 3, 3))
    p["b2"] = conv_bias(ks[3], (filters, filters, 3, 3))
    p["w3"] = xavier_normal(ks[4], (filters, filters, 1, 1))
    p["b3"] = conv_bias(ks[5], (filters, filters, 1, 1))
    p["ws"] = xavier_normal(ks[6], (filters, channels, 3, 3))
    p["bs"] = conv_bias(ks[7], (filters, channels, 3, 3))
    return p


# ---------------- pure-JAX reference (NCHW, mirrors PyTorch) ----------------

def ref_forward(params, x):
    def bn(x, g, b):
        mean = jnp.mean(x, axis=(0, 2, 3), keepdims=True)
        var = jnp.mean((x - mean) ** 2, axis=(0, 2, 3), keepdims=True)
        return (x - mean) * lax.rsqrt(var + EPS) * g.reshape(1, -1, 1, 1) + b.reshape(1, -1, 1, 1)

    def conv(x, w, b, pad):
        y = lax.conv_general_dilated(x, w, (1, 1), ((pad, pad), (pad, pad)),
                                     dimension_numbers=("NCHW", "OIHW", "NCHW"))
        return y + b.reshape(1, -1, 1, 1)

    r = jnp.maximum(bn(x, params["bn1_g"], params["bn1_b"]), 0.0)
    r = conv(r, params["w1"], params["b1"], 1)
    r = jnp.maximum(bn(r, params["bn2_g"], params["bn2_b"]), 0.0)
    r = conv(r, params["w2"], params["b2"], 1)
    r = conv(r, params["w3"], params["b3"], 0)
    s = conv(x, params["ws"], params["bs"], 1)
    return r + s


if __name__ == "__main__":
    key = jax.random.PRNGKey(0)
    kx, kp = jax.random.split(key)
    N, C, F, H, W = 2, 4, 8, 16, 16

    x = jax.random.normal(kx, (N, C, H, W), dtype=jnp.float32)
    params = init_params(kp, C, F)

    out = jax.block_until_ready(resblock_forward(params, x))
    ref = ref_forward(params, x)
    assert out.shape == (N, F, H, W)

    # bf16 MXU operands + bf16 z1 (f32 accumulation) -> relaxed tolerance; with
    # USE_BF16 = False the kernels match the f32 reference to ~1e-4.
    tol = 5e-2 if USE_BF16 else 1e-4
    np.testing.assert_allclose(np.asarray(out), np.asarray(ref), rtol=tol, atol=tol)

    print("KERNEL_OK")
</pallas_src>

<mosaic_0001>
module attributes {stable_mosaic.version = 11 : i64} {
  func.func @_stats_kernel(%arg0: i32, %arg1: memref<16x128xf32, #tpu.memory_space<vmem>>, %arg2: memref<1x128xf32, #tpu.memory_space<vmem>>, %arg3: memref<1x128xf32, #tpu.memory_space<vmem>>) attributes {dimension_semantics = [#tpu.dimension_semantics<arbitrary>], iteration_bounds = array<i64: 1>, scalar_prefetch = 0 : i64, scratch_operands = 0 : i64, tpu.core_type = #tpu.core_type<tc>, window_params = [{transform_indices = @transform_0, window_bounds = array<i64: 16, 128>}, {pipeline_mode = #tpu.pipeline_mode<synchronous>, transform_indices = @transform_1, window_bounds = array<i64: 1, 128>}, {pipeline_mode = #tpu.pipeline_mode<synchronous>, transform_indices = @transform_2, window_bounds = array<i64: 1, 128>}]} {
    %c0_i32 = arith.constant 0 : i32
    %0 = arith.cmpi eq, %arg0, %c0_i32 : i32
    %1 = arith.extui %0 : i1 to i32
    %c0_i32_0 = arith.constant 0 : i32
    %2 = arith.cmpi ne, %1, %c0_i32_0 : i32
    scf.if %2 {
      %cst_11 = arith.constant 0.000000e+00 : f32
      %15 = vector.broadcast %cst_11 : f32 to vector<1x128xf32>
      %c0_12 = arith.constant 0 : index
      %c0_13 = arith.constant 0 : index
      %16 = vector.load %arg2[%c0_12, %c0_13] : memref<1x128xf32, #tpu.memory_space<vmem>>, vector<1x128xf32>
      tpu.vector_store %arg2[%c0_12, %c0_13], %15 {strides = array<i32>} : memref<1x128xf32, #tpu.memory_space<vmem>>, vector<1x128xf32>,
      %cst_14 = arith.constant 0.000000e+00 : f32
      %17 = vector.broadcast %cst_14 : f32 to vector<1x128xf32>
      %c0_15 = arith.constant 0 : index
      %c0_16 = arith.constant 0 : index
      %18 = vector.load %arg3[%c0_15, %c0_16] : memref<1x128xf32, #tpu.memory_space<vmem>>, vector<1x128xf32>
      tpu.vector_store %arg3[%c0_15, %c0_16], %17 {strides = array<i32>} : memref<1x128xf32, #tpu.memory_space<vmem>>, vector<1x128xf32>,
    } else {
    }
    %c0 = arith.constant 0 : index
    %c0_1 = arith.constant 0 : index
    %3 = vector.load %arg1[%c0, %c0_1] : memref<16x128xf32, #tpu.memory_space<vmem>>, vector<16x128xf32>
    %c0_2 = arith.constant 0 : index
    %c0_3 = arith.constant 0 : index
    %4 = vector.load %arg2[%c0_2, %c0_3] : memref<1x128xf32, #tpu.memory_space<vmem>>, vector<1x128xf32>
    %cst = arith.constant dense<0.000000e+00> : vector<128xf32>
    %5 = vector.multi_reduction <add>, %3, %cst [0] : vector<16x128xf32> to vector<128xf32>
    %6 = vector.shape_cast %5 : vector<128xf32> to vector<1x128xf32>
    %7 = arith.addf %4, %6 : vector<1x128xf32>
    %c0_4 = arith.constant 0 : index
    %c0_5 = arith.constant 0 : index
    %8 = vector.load %arg2[%c0_4, %c0_5] : memref<1x128xf32, #tpu.memory_space<vmem>>, vector<1x128xf32>
    tpu.vector_store %arg2[%c0_4, %c0_5], %7 {strides = array<i32>} : memref<1x128xf32, #tpu.memory_space<vmem>>, vector<1x128xf32>,
    %c0_6 = arith.constant 0 : index
    %c0_7 = arith.constant 0 : index
    %9 = vector.load %arg3[%c0_6, %c0_7] : memref<1x128xf32, #tpu.memory_space<vmem>>, vector<1x128xf32>
    %10 = arith.mulf %3, %3 : vector<16x128xf32>
    %cst_8 = arith.constant dense<0.000000e+00> : vector<128xf32>
    %11 = vector.multi_reduction <add>, %10, %cst_8 [0] : vector<16x128xf32> to vector<128xf32>
    %12 = vector.shape_cast %11 : vector<128xf32> to vector<1x128xf32>
    %13 = arith.addf %9, %12 : vector<1x128xf32>
    %c0_9 = arith.constant 0 : index
    %c0_10 = arith.constant 0 : index
    %14 = vector.load %arg3[%c0_9, %c0_10] : memref<1x128xf32, #tpu.memory_space<vmem>>, vector<1x128xf32>
    tpu.vector_store %arg3[%c0_9, %c0_10], %13 {strides = array<i32>} : memref<1x128xf32, #tpu.memory_space<vmem>>, vector<1x128xf32>,
    return
  }
  func.func @transform_0(%arg0: i32) -> (i32, i32) {
    %c0_i32 = arith.constant 0 : i32
    %c0_i32_0 = arith.constant 0 : i32
    return %arg0, %c0_i32 : i32, i32
  }
  func.func @transform_1(%arg0: i32) -> (i32, i32) {
    %c0_i32 = arith.constant 0 : i32
    %c0_i32_0 = arith.constant 0 : i32
    %c0_i32_1 = arith.constant 0 : i32
    return %c0_i32, %c0_i32_0 : i32, i32
  }
  func.func @transform_2(%arg0: i32) -> (i32, i32) {
    %c0_i32 = arith.constant 0 : i32
    %c0_i32_0 = arith.constant 0 : i32
    %c0_i32_1 = arith.constant 0 : i32
    return %c0_i32, %c0_i32_0 : i32, i32
  }
}

</mosaic_0001>

<bundles_post_ra>
// kernel: tpu_custom_call.1
= control target key start
LH: loop header
LB: loop body
LE: loop exit
PB: predicated region body
PF: predicated region fallthrough
CT: control target
= control target key end

     0   :  { %8 = vsyncpa [#allocation3], 0  ;;  %s205_s0 = inlined_call_operand.hbm [shape: f32[16,128], index: 0, kind: input, shape index: {}]   ;;  %s206_s1 = inlined_call_operand.hbm [shape: f32[1,128], index: 1, kind: output, shape index: {0}]   ;;  %s207_s2 = inlined_call_operand.hbm [shape: f32[1,128], index: 2, kind: output, shape index: {1}]  }
   0x1   :  { %9 = vsyncpa [#allocation4], 0 }
   0x2   :  { %10 = vsyncpa [#allocation7], 0  ;;  %s15_s11 = sshll.u32 %s205_s0, 4  ;;  %s175_s12 = smov [#allocation2]   ;;  %s16_s11 = int_to_ptr.hbm [resolvable:$true] %s15_s11 }
   0x3   :  { %s17_s13 = sshll.u32 %s175_s12, 4  ;;  %s176_s14 = smov 128   ;;  %s18_s13 = int_to_ptr.vmem [resolvable:$true] %s17_s13 }
   0x4   :  { %s177_s15 = smov 8  }
   0x5   :  { %23 = dma.hbm_to_vmem [thread:$0]  %s16_s11, 256, %s18_s13, [#allocation3], %s176_s14, %s176_s14, %s177_s15  }
   0x6   :  { %169 = dma.done.wait [#allocation3], 256  }
   0x7   :  { %170 = vsyncadd [#allocation3], 4294967040  ;;  %v178_v0 = vmov 0.0   ;;  %v34_v1 = vld [vmem:[#allocation2] sm:$0xff]  ;;  %v35_v2 = vld [vmem:[#allocation2 + $0x8] sm:$0xff]  ;;  %s179_s0 = smov [#allocation5]  }
   0x8   :  { %32 = vst [vmem:[#allocation5] sm:$0x1] %v178_v0  ;;  %v37_v3 = vadd.f32 %v35_v2, %v34_v1  ;;  %v47_v4 = vmul.f32 %v34_v1, %v34_v1  ;;  %v48_v5 = vmul.f32 %v35_v2, %v35_v2  ;;  %s63_s16 = sshll.u32 %s179_s0, 4  ;;  %s65_s19 = sshll.u32 %s206_s1, 4  ;;  %s64_s16 = int_to_ptr.vmem [resolvable:$true] %s63_s16  ;;  %s66_s19 = int_to_ptr.hbm [resolvable:$true] %s65_s19 }
   0x9   :  { %33 = vst [vmem:[#allocation6] sm:$0x1] %v178_v0  ;;  %s180_s20 = smov [#allocation6]   ;;  %s76_s24 = sshll.u32 %s207_s2, 4  ;;  %s77_s24 = int_to_ptr.hbm [resolvable:$true] %s76_s24 }
   0xa   :  { %v38_v6 = vrot.slane %v37_v3, 4  ;;  %v49_v7 = vadd.f32 %v48_v5, %v47_v4  ;;  %s74_s21 = sshll.u32 %s180_s20, 4  ;;  %s75_s21 = int_to_ptr.vmem [resolvable:$true] %s74_s21 }
   0xc   :  { %v39_v8 = vadd.f32 %v38_v6, %v37_v3  ;;  %v50_v9 = vrot.slane %v49_v7, 4 }
   0xe   :  { %v40_v10 = vrot.slane %v39_v8, 2  ;;  %v51_v11 = vadd.f32 %v50_v9, %v49_v7 }
   0xf   :  { %v36_v16 = vld [vmem:[#allocation5] sm:$0x1] }
  0x10   :  { %v41_v12 = vadd.f32 %v40_v10, %v39_v8  ;;  %v52_v13 = vrot.slane %v51_v11, 2  ;;  %v46_v19 = vld [vmem:[#allocation6] sm:$0x1] }
  0x12   :  { %v42_v14 = vrot.slane %v41_v12, 1  ;;  %v53_v15 = vadd.f32 %v52_v13, %v51_v11 }
  0x14   :  { %v43_v17 = vadd.f32 %v42_v14, %v41_v12  ;;  %v54_v18 = vrot.slane %v53_v15, 1 }
  0x16   :  { %v44_v20 = vadd.f32 %v43_v17, %v36_v16  ;;  %v55_v21 = vadd.f32 %v54_v18, %v53_v15 }
  0x18   :  { %45 = vst [vmem:[#allocation5] sm:$0x1] %v44_v20  ;;  %v56_v22 = vadd.f32 %v55_v21, %v46_v19 }
  0x19   :  { %68 = dma.vmem_to_hbm [thread:$0]  %s64_s16, 16, %s66_s19, [#allocation4]  }
  0x1a   :  { %57 = vst [vmem:[#allocation6] sm:$0x1] %v56_v22 }
  0x1b   :  { %79 = dma.vmem_to_hbm [thread:$0]  %s75_s21, 16, %s77_s24, [#allocation7]  }
  0x1c   :  { %171 = dma.done.wait [#allocation4], 16  }
  0x1d   :  { %172 = vsyncadd [#allocation4], 4294967280 }
  0x1e   :  { %173 = dma.done.wait [#allocation7], 16  }
  0x1f   :  { %174 = vsyncadd [#allocation7], 4294967280 }
  0x20   :  { %88 = vsyncpa [#allocation3], 1 }
  0x21   :  { %89 = vsyncpa [#allocation4], 1 }
  0x22   :  { %90 = vsyncpa [#allocation7], 1 }

</bundles_post_ra>
